<compile_context>
chip_gen: v6e
topology: v6e:2x2x1
jax: 0.10.0
libtpu: 0.0.40
codegen_flags: <defaults>
</compile_context>

<pallas_src>
import jax
import jax.numpy as jnp
from jax.experimental import pallas as pl
from jax.experimental.pallas import tpu as pltpu


def _gcn_kernel(g_ref, adj_ref, w_ref, d_ref, b_ref, o_ref):
    # g_ref:   (Bb, N, Fin)   MXU dtype (bf16 by default)
    # adj_ref: (N, N)         MXU dtype (resident)
    # w_ref:   (Fin, Fout)    MXU dtype (resident)
    # d_ref:   (N, 1)         f32 (resident, precomputed rsqrt degrees)
    # b_ref:   (1, Fout)      f32 (resident)
    # o_ref:   (Bb, N, Fout)  output dtype
    bb, n, fin = g_ref.shape
    fout = w_ref.shape[1]

    # Node-major row ordering so the whole batch block can be lane-concatenated later.
    x = jnp.transpose(g_ref[...], (1, 0, 2)).reshape(n * bb, fin)          # (N*Bb, Fin)

    # support = X @ W  (single MXU matmul with M = N*Bb rows, f32 accumulation)
    support = jnp.dot(x, w_ref[...], preferred_element_type=jnp.float32)   # (N*Bb, Fout) f32

    # D^{-1/2} A D^{-1/2} (X W) == d * (A @ (d * XW)); d is row-broadcast only (no diag matmul).
    d = d_ref[...]                                                          # (N, 1) f32
    s_all = (d * support.reshape(n, bb * fout)).astype(adj_ref.dtype)       # (N, Bb*Fout)

    # One wide aggregation matmul against the shared adjacency (lane dim = Bb*Fout).
    agg = jnp.dot(adj_ref[...], s_all, preferred_element_type=jnp.float32)  # (N, Bb*Fout) f32

    out = jnp.maximum(d.reshape(n, 1, 1) * agg.reshape(n, bb, fout) + b_ref[...], 0.0)
    o_ref[...] = jnp.transpose(out.astype(o_ref.dtype), (1, 0, 2))          # (Bb, N, Fout)


def _choose_batch_block(batch, num_nodes, target_rows=256):
    """Largest divisor Bb of batch with Bb*N <= target rows, preferring >= 2 grid steps."""
    divisors = [d for d in range(1, batch + 1) if batch % d == 0]
    fits = [d for d in divisors if d * num_nodes <= max(target_rows, num_nodes)] or [1]
    two_step = [d for d in fits if batch // d >= 2]     # keep both v7x TCs busy when possible
    return max(two_step) if two_step else max(fits)


def _resident_spec(block_shape, index_map, single_buffer):
    """BlockSpec for constant-index operands; single-buffer them when requested/supported."""
    if single_buffer and hasattr(pl, "Buffered"):
        try:
            return pl.BlockSpec(block_shape, index_map, pipeline_mode=pl.Buffered(1))
        except TypeError:   # older JAX without the pipeline_mode kwarg
            pass
    return pl.BlockSpec(block_shape, index_map)


def _vmem_ceiling_bytes():
    cap = 64 * 1024 * 1024          # conservative default (v7x per-TC physical VMEM)
    try:
        info = pltpu.get_tpu_info()
        cap = int(getattr(info, "vmem_capacity_bytes", cap))
    except Exception:
        pass
    return int(0.9 * cap)           # leave headroom for compiler scratch / semaphores


def gcn_forward(graph, adj, weight, bias=None, *, mxu_dtype=jnp.bfloat16, out_dtype=None,
                single_buffer_constants=None):
    """GCN forward. graph: (B, N, Fin); adj: (N, N); weight: (Fin, Fout); bias: (Fout,) or None.

    Returns (output, adj) to mirror the PyTorch module's forward().
    """
    # TODO(synk): support batched (B, N, N) adjacency (the module's adj.dim()==3 branch);
    # the forward() docstring specifies a shared 2-D adjacency, which is what we handle here.
    B, N, Fin = graph.shape
    Fout = weight.shape[1]
    out_dtype = graph.dtype if out_dtype is None else out_dtype
    if bias is None:
        bias = jnp.zeros((Fout,), jnp.float32)
    bias2d = bias.reshape(1, Fout).astype(jnp.float32)

    # Hoisted, batch-invariant degree normalization (computed from the ORIGINAL adj in f32).
    rowsum = jnp.sum(adj.astype(jnp.float32), axis=-1, keepdims=True)       # (N, 1)
    rowsum = jnp.where(rowsum == 0.0, 1.0, rowsum)
    d = rowsum ** -0.5                                                       # (N, 1) f32

    Bb = _choose_batch_block(B, N)
    grid = (B // Bb,)

    mxu_bytes = jnp.dtype(mxu_dtype).itemsize
    out_bytes = jnp.dtype(out_dtype).itemsize
    rows = Bb * N

    const_bytes = (N * N + Fin * Fout) * mxu_bytes + (N + Fout) * 4
    if single_buffer_constants is None:
        single_buffer_constants = const_bytes > 4 * 1024 * 1024
    const_bufs = 1 if single_buffer_constants else 2

    # --- explicit VMEM budget (pipelined blocks + resident constants + f32 intermediates) ---
    est_vmem = (
        2 * (rows * Fin * mxu_bytes + rows * Fout * out_bytes)   # double-buffered graph/out tiles
        + const_bufs * const_bytes                               # adj, W, d, bias
        + rows * Fin * mxu_bytes                                 # transposed x copy
        + rows * Fout * (4 + mxu_bytes + 4 + 4)                  # support f32, s_all, agg f32, out f32
    )
    vmem_limit_bytes = None
    if est_vmem > 30 * 1024 * 1024:
        vmem_limit_bytes = min(int(1.25 * est_vmem), _vmem_ceiling_bytes())

    cost = pl.CostEstimate(
        flops=int(2 * B * N * Fin * Fout + 2 * B * N * N * Fout),
        transcendentals=0,
        bytes_accessed=int(
            B * N * Fin * mxu_bytes + N * N * mxu_bytes + Fin * Fout * mxu_bytes
            + (N + Fout) * 4 + B * N * Fout * out_bytes
        ),
    )

    out = pl.pallas_call(
        _gcn_kernel,
        out_shape=jax.ShapeDtypeStruct((B, N, Fout), out_dtype),
        grid_spec=pltpu.PrefetchScalarGridSpec(
            num_scalar_prefetch=0,
            grid=grid,
            in_specs=[
                pl.BlockSpec((Bb, N, Fin), lambda i: (i, 0, 0)),                      # graphs
                _resident_spec((N, N), lambda i: (0, 0), single_buffer_constants),    # adjacency
                _resident_spec((Fin, Fout), lambda i: (0, 0), single_buffer_constants),  # W
                _resident_spec((N, 1), lambda i: (0, 0), single_buffer_constants),    # d = rsqrt(deg)
                _resident_spec((1, Fout), lambda i: (0, 0), single_buffer_constants), # bias
            ],
            out_specs=pl.BlockSpec((Bb, N, Fout), lambda i: (i, 0, 0)),
        ),
        compiler_params=pltpu.CompilerParams(
            dimension_semantics=("parallel",),
            vmem_limit_bytes=vmem_limit_bytes,
        ),
        cost_estimate=cost,
    )(
        graph.astype(mxu_dtype),
        adj.astype(mxu_dtype),
        weight.astype(mxu_dtype),
        d,
        bias2d,
    )
    return out, adj


def gcn_ref(graph, adj, weight, bias):
    """Pure-JAX f32 reference mirroring the PyTorch module."""
    rowsum = jnp.sum(adj, axis=-1)
    rowsum = jnp.where(rowsum == 0.0, 1.0, rowsum)
    d_inv_sqrt = rowsum ** -0.5
    d_mat = jnp.diag(d_inv_sqrt)
    adj_norm = d_mat @ adj @ d_mat
    support = graph @ weight
    out = jnp.matmul(adj_norm, support)          # (N,N) broadcast against (B,N,Fout)
    if bias is not None:
        out = out + bias
    return jnp.maximum(out, 0.0)


if __name__ == "__main__":
    # Small shapes implied by the module: (batch, num_nodes, in_features) features + (N, N) adj.
    # batch=16 / N=16 lets the kernel pack Bb=8 graphs per step (MXU M dim = 128) while keeping
    # 2 grid steps; Fin=Fout=128 keeps loads/stores lane-dense.
    batch, num_nodes, in_features, out_features = 16, 16, 128, 128

    key = jax.random.PRNGKey(0)
    kx, ka, kw, kb = jax.random.split(key, 4)

    graph = jax.random.normal(kx, (batch, num_nodes, in_features), dtype=jnp.float32)

    # Deterministic symmetric 0/1 adjacency with self-loops, plus one fully isolated node
    # (rowsum == 0) to exercise the zero-degree clamp.
    a = (jax.random.uniform(ka, (num_nodes, num_nodes)) < 0.3).astype(jnp.float32)
    adj = jnp.maximum(a, a.T)
    adj = jnp.maximum(adj, jnp.eye(num_nodes, dtype=jnp.float32))
    adj = adj.at[num_nodes - 1, :].set(0.0).at[:, num_nodes - 1].set(0.0)

    # nn.Linear-style init: uniform(-1/sqrt(out_features), 1/sqrt(out_features)).
    stdv = 1.0 / (out_features ** 0.5)
    weight = jax.random.uniform(kw, (in_features, out_features), jnp.float32, -stdv, stdv)
    bias = jax.random.uniform(kb, (out_features,), jnp.float32, -stdv, stdv)

    ref = gcn_ref(graph, adj, weight, bias)

    # Default (bf16 MXU operands, f32 accumulation + f32 output): loosened tolerance for bf16.
    out_bf16, adj_out = gcn_forward(graph, adj, weight, bias)
    jax.block_until_ready(out_bf16)
    assert out_bf16.shape == ref.shape and out_bf16.dtype == graph.dtype
    assert jnp.allclose(out_bf16, ref, atol=5e-2, rtol=5e-2), "bf16-MXU path mismatch vs reference"
    assert jnp.array_equal(adj_out, adj), "adjacency must be passed through unchanged"

    # Full-f32 MXU path: tight tolerance.
    out_f32, _ = gcn_forward(graph, adj, weight, bias, mxu_dtype=jnp.float32)
    jax.block_until_ready(out_f32)
    assert jnp.allclose(out_f32, ref, atol=2e-4, rtol=2e-4), "f32 path mismatch vs reference"

    # bf16 output path (halves writeback traffic); loose tolerance, just checking it runs.
    out_lo, _ = gcn_forward(graph, adj, weight, bias, out_dtype=jnp.bfloat16)
    jax.block_until_ready(out_lo)
    assert out_lo.dtype == jnp.bfloat16
    assert jnp.allclose(out_lo.astype(jnp.float32), ref, atol=1e-1, rtol=1e-1)

    print("KERNEL_OK")
</pallas_src>

<mosaic_0001>
module attributes {stable_mosaic.version = 11 : i64} {
  func.func @_gcn_kernel(%arg0: i32, %arg1: memref<8x16x128xbf16, #tpu.memory_space<vmem>>, %arg2: memref<16x16xbf16, #tpu.memory_space<vmem>>, %arg3: memref<128x128xbf16, #tpu.memory_space<vmem>>, %arg4: memref<16x1xf32, #tpu.memory_space<vmem>>, %arg5: memref<1x128xf32, #tpu.memory_space<vmem>>, %arg6: memref<8x16x128xf32, #tpu.memory_space<vmem>>) attributes {dimension_semantics = [#tpu.dimension_semantics<parallel>], iteration_bounds = array<i64: 2>, scalar_prefetch = 0 : i64, scratch_operands = 0 : i64, tpu.core_type = #tpu.core_type<tc>, window_params = [{transform_indices = @transform_0, window_bounds = array<i64: 8, 16, 128>}, {pipeline_mode = #tpu.pipeline_mode<synchronous>, transform_indices = @transform_1, window_bounds = array<i64: 16, 16>}, {pipeline_mode = #tpu.pipeline_mode<synchronous>, transform_indices = @transform_2, window_bounds = array<i64: 128, 128>}, {pipeline_mode = #tpu.pipeline_mode<synchronous>, transform_indices = @transform_3, window_bounds = array<i64: 16, 1>}, {pipeline_mode = #tpu.pipeline_mode<synchronous>, transform_indices = @transform_4, window_bounds = array<i64: 1, 128>}, {transform_indices = @transform_5, window_bounds = array<i64: 8, 16, 128>}]} {
    %c0 = arith.constant 0 : index
    %c0_0 = arith.constant 0 : index
    %c0_1 = arith.constant 0 : index
    %0 = vector.load %arg1[%c0, %c0_0, %c0_1] : memref<8x16x128xbf16, #tpu.memory_space<vmem>>, vector<8x16x128xbf16>
    %1 = tpu.transpose %0, [1, 0, 2] : vector<8x16x128xbf16> -> vector<16x8x128xbf16>
    %2 = vector.shape_cast %1 : vector<16x8x128xbf16> to vector<128x128xbf16>
    %c0_2 = arith.constant 0 : index
    %c0_3 = arith.constant 0 : index
    %3 = vector.load %arg3[%c0_2, %c0_3] : memref<128x128xbf16, #tpu.memory_space<vmem>>, vector<128x128xbf16>
    %cst = arith.constant dense<0.000000e+00> : vector<128x128xf32>
    %4 = tpu.matmul %2, %3, %cst {dimension_numbers = #tpu.dot_dimension_numbers<[1], [0], [0], [1], [0, 0, 1, 1], [], []>} : vector<128x128xbf16>, vector<128x128xbf16>, vector<128x128xf32> -> vector<128x128xf32>
    %c0_4 = arith.constant 0 : index
    %c0_5 = arith.constant 0 : index
    %5 = vector.load %arg4[%c0_4, %c0_5] : memref<16x1xf32, #tpu.memory_space<vmem>>, vector<16x1xf32>
    %6 = vector.shape_cast %4 : vector<128x128xf32> to vector<16x1024xf32>
    %7 = vector.broadcast %5 : vector<16x1xf32> to vector<16x1024xf32>
    %8 = arith.mulf %7, %6 : vector<16x1024xf32>
    %9 = arith.truncf %8 : vector<16x1024xf32> to vector<16x1024xbf16>
    %c0_6 = arith.constant 0 : index
    %c0_7 = arith.constant 0 : index
    %10 = vector.load %arg2[%c0_6, %c0_7] : memref<16x16xbf16, #tpu.memory_space<vmem>>, vector<16x16xbf16>
    %cst_8 = arith.constant dense<0.000000e+00> : vector<16x1024xf32>
    %11 = tpu.matmul %10, %9, %cst_8 {dimension_numbers = #tpu.dot_dimension_numbers<[1], [0], [0], [1], [0, 0, 1, 1], [], []>} : vector<16x16xbf16>, vector<16x1024xbf16>, vector<16x1024xf32> -> vector<16x1024xf32>
    %12 = vector.shape_cast %5 : vector<16x1xf32> to vector<16x1x1xf32>
    %13 = vector.shape_cast %11 : vector<16x1024xf32> to vector<16x8x128xf32>
    %14 = vector.broadcast %12 : vector<16x1x1xf32> to vector<16x8x128xf32>
    %15 = arith.mulf %14, %13 : vector<16x8x128xf32>
    %c0_9 = arith.constant 0 : index
    %c0_10 = arith.constant 0 : index
    %16 = vector.load %arg5[%c0_9, %c0_10] : memref<1x128xf32, #tpu.memory_space<vmem>>, vector<1x128xf32>
    %17 = vector.shape_cast %16 : vector<1x128xf32> to vector<1x1x128xf32>
    %18 = vector.broadcast %17 : vector<1x1x128xf32> to vector<16x8x128xf32>
    %19 = arith.addf %15, %18 : vector<16x8x128xf32>
    %cst_11 = arith.constant 0.000000e+00 : f32
    %20 = vector.broadcast %cst_11 : f32 to vector<16x8x128xf32>
    %21 = arith.maximumf %19, %20 : vector<16x8x128xf32>
    %22 = tpu.transpose %21, [1, 0, 2] : vector<16x8x128xf32> -> vector<8x16x128xf32>
    %c0_12 = arith.constant 0 : index
    %c0_13 = arith.constant 0 : index
    %c0_14 = arith.constant 0 : index
    %23 = vector.load %arg6[%c0_12, %c0_13, %c0_14] : memref<8x16x128xf32, #tpu.memory_space<vmem>>, vector<8x16x128xf32>
    tpu.vector_store %arg6[%c0_12, %c0_13, %c0_14], %22 {strides = array<i32>} : memref<8x16x128xf32, #tpu.memory_space<vmem>>, vector<8x16x128xf32>,
    return
  }
  func.func @transform_0(%arg0: i32) -> (i32, i32, i32) {
    %c0_i32 = arith.constant 0 : i32
    %c0_i32_0 = arith.constant 0 : i32
    %c0_i32_1 = arith.constant 0 : i32
    return %arg0, %c0_i32, %c0_i32_0 : i32, i32, i32
  }
  func.func @transform_1(%arg0: i32) -> (i32, i32) {
    %c0_i32 = arith.constant 0 : i32
    %c0_i32_0 = arith.constant 0 : i32
    %c0_i32_1 = arith.constant 0 : i32
    return %c0_i32, %c0_i32_0 : i32, i32
  }
  func.func @transform_2(%arg0: i32) -> (i32, i32) {
    %c0_i32 = arith.constant 0 : i32
    %c0_i32_0 = arith.constant 0 : i32
    %c0_i32_1 = arith.constant 0 : i32
    return %c0_i32, %c0_i32_0 : i32, i32
  }
  func.func @transform_3(%arg0: i32) -> (i32, i32) {
    %c0_i32 = arith.constant 0 : i32
    %c0_i32_0 = arith.constant 0 : i32
    %c0_i32_1 = arith.constant 0 : i32
    return %c0_i32, %c0_i32_0 : i32, i32
  }
  func.func @transform_4(%arg0: i32) -> (i32, i32) {
    %c0_i32 = arith.constant 0 : i32
    %c0_i32_0 = arith.constant 0 : i32
    %c0_i32_1 = arith.constant 0 : i32
    return %c0_i32, %c0_i32_0 : i32, i32
  }
  func.func @transform_5(%arg0: i32) -> (i32, i32, i32) {
    %c0_i32 = arith.constant 0 : i32
    %c0_i32_0 = arith.constant 0 : i32
    %c0_i32_1 = arith.constant 0 : i32
    return %arg0, %c0_i32, %c0_i32_0 : i32, i32, i32
  }
}

</mosaic_0001>

<bundles_post_ra>
// kernel: tpu_custom_call.1
= control target key start
LH: loop header
LB: loop body
LE: loop exit
PB: predicated region body
PF: predicated region fallthrough
CT: control target
= control target key end

     0   :  { %10 = vsyncpa [#allocation3], 0  ;;  %s2988_s0 = inlined_call_operand.hbm [shape: bf16[16,16,128], index: 0, kind: input, shape index: {}]   ;;  %s2989_s1 = inlined_call_operand.vmem [shape: bf16[16,16], index: 1, kind: input, shape index: {}]   ;;  %s2990_s2 = inlined_call_operand.hbm [shape: bf16[128,128], index: 2, kind: input, shape index: {}]   ;;  %s2991_s3 = inlined_call_operand.vmem [shape: f32[16,1], index: 3, kind: input, shape index: {}]   ;;  %s2992_s4 = inlined_call_operand.vmem [shape: f32[1,128], index: 4, kind: input, shape index: {}]   ;;  %s2993_s5 = inlined_call_operand.hbm [shape: f32[16,16,128], index: 5, kind: output, shape index: {}]  }
   0x1   :  { %12 = vsyncpa [#allocation3 + $0x1], 0 }
   0x2   :  { %13 = vsyncpa [#allocation6], 0 }
   0x3   :  { %14 = vsyncpa [#allocation4], 0 }
   0x4   :  { %16 = vsyncpa [#allocation4 + $0x1], 0  ;;  %s2452_s18 = smov 0   ;;  %s2454_s19 = smov 0  }
   0x5   :  { %s2456_s20 = smov 0   ;;  %s2458_s21 = smov 0  }
   0x6 LB: > { %s2473_s22 = sadd.s32 4294967295, %s2409_s21   ;;  %s2117_s23 = sadd.s32 4294967294, %s2409_s21   ;;  %s2409_s21 = sphi %s2458_s21, %s3017_s21   ;;  %s2405_s20 = sphi %s2456_s20, %s3016_s20   ;;  %s2401_s19 = sphi %s2454_s19, %s3015_s19   ;;  %s2397_s18 = sphi %s2452_s18, %s3014_s18  }
   0x7   : > { %p42_p0 = scmp.ne.s32.totalorder %s2401_s19, %s2397_s18  ;;  %p2994_p1 = scmp.eq.s32.totalorder %s2473_s22, 0 }
   0x8   : > { %p156_p3 = scmp.eq.s32.totalorder %s2117_s23, 1  ;;  %p2118_p5 = scmp.ge.s32.totalorder %s2409_s21, 1 }
   0x9   : > { %p2482_p4 = por %p2994_p1, %p42_p0  ;;  %p163_p7 = scmp.lt.s32.totalorder %s2409_s21, 3 }
   0xa   : > { %p2487_p6 = por %p156_p3, %p42_p0  ;;  %s2411_s27 = smov [#allocation5]  }
   0xb   : > { %s2999_s24 = scalar_select %p2482_p4, 1, 0 }
   0xc   : > { %s3000_s25 = scalar_select %p2487_p6, 1, 0 }
   0xd   : > { %p2492_p8 = pnand %p2118_p5, %p163_p7  ;;  %s178_s28 = sshll.u32 %s2411_s27, 4  ;;  %s179_s28 = int_to_ptr.vmem [resolvable:$true] %s178_s28 }
   0xe   : > { %s2506_s30 = sadd.s32 1, %s2409_s21   ;;  %s29_s6 = sadd.s32 1, %s2405_s20 }
   0xf   : > { %s3001_s26 = scalar_select %p2492_p8, 1, 0 }
  0x10   : > { %p2217_p9 = pneg %p2492_p8  ;;  %s26_s7 = ssub.s32 %s2409_s21, %s2506_s30 }
  0x11   : > { %s2298_s8 = scalar_lea.vmem %s179_s28, 1024  ;;  %p2306_p5 = scmp.lt.s32.totalorder %s179_s28, %s179_s28 }
  0x12   : > { %p2501_p11 = pnand %p2217_p9, %p2994_p1  ;;  %p2299_p13 = scmp.ne.s32.totalorder %s179_s28, %s2298_s8 }
  0x13   : > { %p2307_p7 = scmp.lt.s32.totalorder %s2298_s8, %s2298_s8 }
  0x14   : > { %p2289_p12 = pneg %p2501_p11 }
  0x15   : > { %p2308_p10 = por %p2307_p7, %p2306_p5 }
  0x16   : > { %p2301_p0 = pnand %p2299_p13, %p2289_p12 }
  0x18   : > { %p2302_p3 = pneg %p2301_p0 }
  0x1a   : > { %p2309_p2 = pnand %p2308_p10, %p2302_p3 }
  0x1c   : > { %2312 = shalt.err (!%p2309_p2)
}
  0x1d   : > { %s2995_s9 = smov 64   ;;  %s2413_s10 = smov 4  }
  0x1e   : > { %2220 = dma.hbm_to_vmem [thread:$0]  (!%p2501_p11), %s2990_s2, 1024, %s179_s28, [#allocation6], %s2995_s9, %s2995_s9, %s2413_s10  }
  0x1f   : > { %p27_p2 = scmp.eq.s32.totalorder %s26_s7, 0  ;;  %p36_p9 = scmp.ne.s32.totalorder %s2405_s20, %s2401_s19 }
  0x20   : > { %p37_p10 = scmp.eq.s32.totalorder %s2409_s21, 0  ;;  %p2230_p12 = scmp.lt.s32.totalorder %s2409_s21, 2 }
  0x21   : > { %s2526_s13 = scalar_select %p27_p2, %s2405_s20, %s29_s6  }
  0x22   : > { %p38_p13 = por %p37_p10, %p36_p9  ;;  %p3003_p0 = scmp.eq.s32.totalorder %s2473_s22, 1 }
  0x23   : > { %s198_s15 = sand.u32 1, %s2405_s20   ;;  %s2158_s16 = sshll.u32 %s2409_s21, 10 }
  0x24   : > { %p2530_p3 = por %p3003_p0, %p36_p9  ;;  %s2121_s17 = sshll.u32 %s198_s15, 6 }
  0x25   : > { %s2539_s29 = scalar_lea.hbm %s2988_s0, %s2158_s16  ;;  %s202_s28 = scalar_lea.vmem [#allocation2], %s2121_s17 }
  0x26   : > { %s3004_s14 = scalar_select %p2530_p3, 1, 0 }
  0x27   : > { %s210_s6 = sshll.u32 %s202_s28, 4  ;;  %p2541_p11 = pnand %p2230_p12, %p38_p13  ;;  %s2545_s6 = int_to_ptr.vmem [resolvable:$true] %s210_s6 }
  0x28   : > { %s2547_s8 = scalar_lea.sflag [#allocation3], %s198_s15  ;;  %s2313_s11 = scalar_lea.hbm %s2539_s29, 1024 }
  0x29   : > { %p2314_p5 = scmp.ne.s32.totalorder %s2539_s29, %s2313_s11  ;;  %p2315_p7 = pneg %p2541_p11 }
  0x2a   : > { %s2318_s17 = scalar_lea.hbm %s2988_s0, 2048  ;;  %p2319_p10 = scmp.lt.s32.totalorder %s2539_s29, %s2988_s0 }
  0x2b   : > { %p2316_p2 = pnand %p2315_p7, %p2314_p5  ;;  %p2320_p12 = scmp.lt.s32.totalorder %s2318_s17, %s2313_s11 }
  0x2d   : > { %p2317_p9 = pneg %p2316_p2  ;;  %p2321_p13 = por %p2320_p12, %p2319_p10 }
  0x2f   : > { %p2322_p0 = pnand %p2321_p13, %p2317_p9 }
  0x31   : > { %2325 = shalt.err (!%p2322_p0)
}
  0x32   : > { %s2326_s15 = scalar_lea.vmem %s2545_s6, 1024  ;;  %s2414_s28 = smov [#allocation2]  }
  0x33   : > { %p2327_p1 = scmp.ne.s32.totalorder %s2545_s6, %s2326_s15  ;;  %s2331_s9 = sshll.u32 %s2414_s28, 4  ;;  %s2332_s9 = int_to_ptr.vmem [resolvable:$false] %s2331_s9 }
  0x34   : > { %s2333_s12 = scalar_lea.vmem %s2332_s9, 2048  ;;  %p2334_p2 = scmp.lt.s32.totalorder %s2545_s6, %s2332_s9 }
  0x35   : > { %p2329_p6 = pnand %p2327_p1, %p2315_p7  ;;  %p2335_p3 = scmp.lt.s32.totalorder %s2333_s12, %s2326_s15 }
  0x37   : > { %p2330_p5 = pneg %p2329_p6  ;;  %p2336_p4 = por %p2335_p3, %p2334_p2 }
  0x39   : > { %p2337_p8 = pnand %p2336_p4, %p2330_p5 }
  0x3b   : > { %2340 = shalt.err (!%p2337_p8)
}
  0x3c   : > { %s3006_s11 = smov 64   ;;  %p3007_p1 = scmp.ne.s32.totalorder %s3001_s26, 0 }
  0x3d   : > { %2224 = dma.hbm_to_vmem [thread:$0]  (!%p2541_p11), %s2539_s29, 1024, %s2545_s6, %s2547_s8, %s3006_s11, %s3006_s11, %s2413_s10  }
  0x3e   : > { %222 = sbr.rel (%p3007_p1) target bundleno = 631 (0x277), region = 40  ;;  %s2574_s16 = sand.u32 (!%p3007_p1), 1, %s2401_s19  }
  0x3f   : > { %s2126_s9 = sshll.u32 (!%p3007_p1), %s2574_s16, 6  ;;  %s225_s17 = scalar_lea.sflag (!%p3007_p1), [#allocation3], %s2574_s16 }
  0x40   : > { %s2578_s23 = scalar_lea.vmem (!%p3007_p1), [#allocation2], %s2126_s9  ;;  %p3008_p4 = scmp.ne.s32.totalorder (!%p3007_p1), %s2999_s24, 0 }
  0x43   : > { %2384 = dma.done.wait (%p3008_p4), %s225_s17, 1024  }
  0x44   : > { %2386 = vsyncadd (%p3008_p4), %s225_s17, 4294966272  ;;  %p3009_p6 = scmp.eq.s32.totalorder %s2473_s22, 0 }
  0x46   : > { %2388 = dma.done.wait (%p3009_p6), [#allocation6], 1024   ;;  %p3010_p8 = pmov %p3009_p6 }
  0x47   : > { %v2415_v0 = vmov 0   ;;  %v2276_v1 = vld [vmem:[#allocation5 + $0x38] sm:$0xff]   ;;  %v2416_v2 = vmov 1983009808   ;;  %v282_v4 = vlaneseq  ;;  %v2277_v5 = vld [vmem:[#allocation5 + $0x30] sm:$0xff]   ;;  %v2278_v6 = vld [vmem:[#allocation5 + $0x28] sm:$0xff]  }
  0x48   : > { %2390 = vsyncadd (%p3010_p8), [#allocation6], 4294966272  ;;  %2274 = vset.pattern.permute.xlu0 %v2415_v0  ;;  %1038 = vmatprep.mubr.bf16.mxu1 %v2415_v0  ;;  %v280_v3 = vunpack.c.l.s4 %v2416_v2  ;;  %v2417_v9 = vmov 1934713408   ;;  %v2279_v11 = vld [vmem:[#allocation5 + $0x20] sm:$0xff]   ;;  %v2280_v20 = vld [vmem:[#allocation5 + $0x18] sm:$0xff]  }
  0x49   : > { %2275 = vset.pattern.permute.xlu1 %v2415_v0  ;;  %2177 = vmatprep.subr.bf16.mxu0 %v2276_v1  ;;  %v2591_v8 = vshrl.u32 %v282_v4, 7  ;;  %v297_v10 = vunpack.c.l.s4 %v2417_v9  ;;  %v262_v12 = vld [vmem:[%s2578_s23] sm:$0xf]  ;;  %v264_v13 = vld [vmem:[%s2578_s23 + $0x8] sm:$0xf]  ;;  %v2281_v52 = vld [vmem:[#allocation5 + $0x10] sm:$0xff]  }
  0x4a   : > { %2178 = vmatpush3.bf16.msra.mxu0 %v2276_v1  ;;  %v281_v7 = vunpack.c.0.s8 %v280_v3  ;;  %v266_v14 = vld [vmem:[%s2578_s23 + $0x10] sm:$0xf]  ;;  %v268_v17 = vld [vmem:[%s2578_s23 + $0x18] sm:$0xf]  ;;  %v270_v18 = vld [vmem:[%s2578_s23 + $0x20] sm:$0xf] }
  0x4b   : > { %2179 = vmatprep.subr.bf16.mxu0 %v2277_v5  ;;  %v298_v16 = vunpack.c.0.s8 %v297_v10  ;;  %v272_v19 = vld [vmem:[%s2578_s23 + $0x28] sm:$0xf]  ;;  %v274_v21 = vld [vmem:[%s2578_s23 + $0x30] sm:$0xf]  ;;  %v276_v22 = vld [vmem:[%s2578_s23 + $0x38] sm:$0xf]  ;;  %v278_v23 = vcombine.low %v262_v12, %v270_v18 }
  0x4c   : > { %v2597_v15 = vsub.s32 %v281_v7, %v2591_v8  ;;  %v312_v24 = vcombine.low %v264_v13, %v272_v19  ;;  %v263_v25 = vld [vmem:[%s2578_s23 + $0x4] sm:$0xf]  ;;  %v286_v26 = vcombine.low %v266_v14, %v274_v21  ;;  %v320_v27 = vcombine.low %v268_v17, %v276_v22  ;;  %v265_v28 = vld [vmem:[%s2578_s23 + $0xc] sm:$0xf]  ;;  %v267_v29 = vld [vmem:[%s2578_s23 + $0x14] sm:$0xf] }
  0x4d   : > { %v269_v30 = vld [vmem:[%s2578_s23 + $0x1c] sm:$0xf]  ;;  %v2610_v32 = vsub.s32 %v298_v16, %v2591_v8  ;;  %v2418_v34 = vmov 1966171168   ;;  %v271_v36 = vld [vmem:[%s2578_s23 + $0x24] sm:$0xf] }
  0x4e   : > { %2180 = vmatpush3.bf16.msra.mxu0 %v2277_v5  ;;  %v285_v31 = vrot.slane %v278_v23, %v2597_v15  ;;  %v319_v33 = vrot.slane %v312_v24, %v2597_v15  ;;  %v692_v35 = vunpack.c.l.s4 %v2418_v34  ;;  %v273_v37 = vld [vmem:[%s2578_s23 + $0x2c] sm:$0xf]  ;;  %v275_v38 = vld [vmem:[%s2578_s23 + $0x34] sm:$0xf]  ;;  %v293_v39 = vrot.slane %v286_v26, %v2597_v15  ;;  %v277_v41 = vld [vmem:[%s2578_s23 + $0x3c] sm:$0xf] }
  0x4f   : > { %2181 = vmatprep.subr.bf16.mxu0 %v2278_v6  ;;  %v327_v40 = vrot.slane %v320_v27, %v2597_v15  ;;  %v346_v42 = vcombine.low %v263_v25, %v271_v36  ;;  %v354_v43 = vcombine.low %v267_v29, %v275_v38  ;;  %v655_v44 = vld [vmem:[%s2991_s3] sm:$0xff]  ;;  %v380_v45 = vcombine.low %v265_v28, %v273_v37  ;;  %v2625_v51 = vld [vmem:[%s2991_s3 + $0x8] sm:$0xff]  ;;  %s2128_s15 = sshll.u32 %s2574_s16, 7  ;;  %s2160_s12 = sshll.u32 %s2473_s22, 11 }
  0x50   : > { %v388_v46 = vcombine.low %v269_v30, %v277_v41  ;;  %659 = vperm.xlu0 %2274, %v655_v44   ;;  %v294_v47 = vcombine.low %v285_v31, %v293_v39  ;;  %v295_v49 = vcombine.high %v285_v31, %v293_v39  ;;  %v693_v53 = vunpack.c.0.s8 %v692_v35  ;;  %v2282_v3 = vld [vmem:[#allocation5 + $0x8] sm:$0xff]   ;;  %v2283_v16 = vld [vmem:[#allocation5] sm:$0xff]   ;;  %s2876_s28 = scalar_lea.vmem [#allocation7], %s2128_s15  ;;  %s2935_s17 = scalar_lea.hbm %s2993_s5, %s2160_s12 }
  0x51   : > { %v328_v48 = vcombine.low %v319_v33, %v327_v40  ;;  %v329_v50 = vcombine.high %v319_v33, %v327_v40  ;;  %v2630_v56 = vrot.slane %v346_v42, %v2597_v15  ;;  %v2633_v57 = vrot.slane %v354_v43, %v2597_v15  ;;  %s2034_s11 = sshll.u32 %s2876_s28, 4  ;;  %s2020_s23 = scalar_lea.sflag [#allocation4], %s2574_s16  ;;  %s2937_s11 = int_to_ptr.vmem [resolvable:$true] %s2034_s11 }
  0x52   : > { %2182 = vmatpush3.bf16.msra.mxu0 %v2278_v6  ;;  %v302_v54 = vrot.slane %v294_v47, %v2610_v32  ;;  %v309_v58 = vrot.slane %v295_v49, %v2610_v32  ;;  %v387_v60 = vrot.slane %v380_v45, %v2597_v15  ;;  %v395_v61 = vrot.slane %v388_v46, %v2597_v15  ;;  %s2341_s24 = scalar_lea.vmem %s2937_s11, 2048  ;;  %p3011_p11 = scmp.ne.s32.totalorder %s3004_s14, 0 }
  0x53   : > { %2183 = vmatprep.subr.bf16.mxu0 %v2279_v11  ;;  %v336_v55 = vrot.slane %v328_v48, %v2610_v32  ;;  %v343_v59 = vrot.slane %v329_v50, %v2610_v32  ;;  %v2643_v6 = vsub.s32 %v693_v53, %v2591_v8  ;;  %v362_v10 = vcombine.low %v2630_v56, %v2633_v57  ;;  %p2342_p3 = scmp.ne.s32.totalorder %s2937_s11, %s2341_s24  ;;  %s2419_s26 = smov [#allocation7]  }
  0x54   : > { %664 = vperm.xlu0 %2274, %v2625_v51   ;;  %v417_v63 = vshrl.u32 %v302_v54, 16  ;;  %v310_v2 = vcombine.high %v302_v54, %v2415_v0  ;;  %v429_v12 = vshrl.u32 %v309_v58, 16  ;;  %v396_v14 = vcombine.low %v387_v60, %v395_v61  ;;  %s2345_s10 = sshll.u32 %s2419_s26, 4  ;;  %s2346_s10 = int_to_ptr.vmem [resolvable:$false] %s2345_s10 }
  0x55   : > { %v416_v62 = vpack.i.b16 %v336_v55, %v302_v54  ;;  %v418_v1 = vshrl.u32 %v336_v55, 16  ;;  %v344_v4 = vcombine.high %v336_v55, %v2415_v0  ;;  %v430_v13 = vshrl.u32 %v343_v59, 16  ;;  %p2343_p7 = pnand %p2342_p3, %p3011_p11  ;;  %s2347_s29 = scalar_lea.vmem %s2346_s10, 4096 }
  0x56   : > { %2184 = vmatpush3.bf16.msra.mxu0 %v2279_v11  ;;  %v423_v7 = vshrl.u32 %v310_v2, 16  ;;  %v1178_v17 = vcombine.high %v655_v44, %v655_v44  ;;  %v2648_v18 = vrot.slane %v655_v44, %v2643_v6  ;;  %v311_v21 = vcombine.high %v309_v58, %v2415_v0  ;;  %p2348_p10 = scmp.lt.s32.totalorder %s2937_s11, %s2346_s10  ;;  %p2349_p12 = scmp.lt.s32.totalorder %s2347_s29, %s2341_s24 }
  0x57   : > { %2185 = vmatprep.subr.bf16.mxu0 %v2280_v20  ;;  %v419_v5 = vpack.i.b16 %v418_v1, %v417_v63  ;;  %v424_v9 = vshrl.u32 %v344_v4, 16  ;;  %v422_v19 = vpack.i.b16 %v344_v4, %v310_v2  ;;  %v345_v22 = vcombine.high %v343_v59, %v2415_v0  ;;  %p2344_p9 = pneg %p2343_p7 }
  0x58   : > { %v428_v23 = vpack.i.b16 %v343_v59, %v309_v58  ;;  %v431_v24 = vpack.i.b16 %v430_v13, %v429_v12  ;;  %v370_v25 = vrot.slane %v362_v10, %v2610_v32  ;;  %v404_v26 = vrot.slane %v396_v14, %v2610_v32  ;;  %p2350_p13 = por %p2349_p12, %p2348_p10 }
  0x59   : > { %v2129_v11 = vcombine.low %v416_v62, %v419_v5  ;;  %v363_v27 = vcombine.high %v2630_v56, %v2633_v57  ;;  %v2657_v28 = vrot.slane %v1178_v17, %v2643_v6  ;;  %v2660_v29 = vsub.s32 0, %v2591_v8 }
  0x5a   : > { %2186 = vmatpush3.bf16.msra.mxu0 %v2280_v20  ;;  %v425_v20 = vpack.i.b16 %v424_v9, %v423_v7  ;;  %v435_v31 = vshrl.u32 %v311_v21, 16  ;;  %v436_v33 = vshrl.u32 %v345_v22, 16  ;;  %v2664_v34 = vrot.slane %v2648_v18, %v2643_v6  ;;  %p2351_p0 = pnand %p2350_p13, %p2344_p9 }
  0x5b   : > { %2187 = vmatprep.subr.bf16.mxu0 %v2281_v52  ;;  %2193 = vmatprep.mubr.bf16.mxu0 %v2129_v11  ;;  %v2131_v35 = vcombine.low %v428_v23, %v431_v24  ;;  %v441_v36 = vshrl.u32 %v370_v25, 16  ;;  %v442_v37 = vshrl.u32 %v404_v26, 16  ;;  %v397_v38 = vcombine.high %v387_v60, %v395_v61 }
  0x5c   : > { %v2130_v30 = vcombine.low %v422_v19, %v425_v20  ;;  %v1223_v39 = vcombine.high %v2664_v34, %v2664_v34  ;;  %v434_v40 = vpack.i.b16 %v345_v22, %v311_v21  ;;  %v1208_v8 = vrot.slane %v2657_v28, %v2643_v6 }
  0x5d   : > { %v437_v41 = vpack.i.b16 %v436_v33, %v435_v31  ;;  %v378_v42 = vcombine.high %v370_v25, %v2415_v0  ;;  %v412_v43 = vcombine.high %v404_v26, %v2415_v0  ;;  %v440_v45 = vpack.i.b16 %v404_v26, %v370_v25 }
  0x5e   : > { %2188 = vmatpush3.bf16.msra.mxu0 %v2281_v52  ;;  %v1559_v44 = vrot.slane %v1223_v39, %v2660_v29  ;;  %v443_v46 = vpack.i.b16 %v442_v37, %v441_v36  ;;  %v377_v47 = vrot.slane %v363_v27, %v2610_v32  ;;  %v411_v48 = vrot.slane %v397_v38, %v2610_v32 }
  0x5f   : > { %2189 = vmatprep.subr.bf16.mxu0 %v2282_v3  ;;  %v1234_v49 = vrot.slane %v2625_v51, %v2643_v6  ;;  %v1567_v50 = vrot.slane %v1208_v8, %v2660_v29  ;;  %v1224_v52 = vcombine.high %v1208_v8, %v1208_v8  ;;  %v2132_v53 = vcombine.low %v434_v40, %v437_v41 }
  0x60   : > { %1621 = vperm.xlu0 %2274, %v1559_v44   ;;  %v447_v54 = vshrl.u32 %v378_v42, 16  ;;  %v448_v55 = vshrl.u32 %v412_v43, 16  ;;  %v2133_v56 = vcombine.low %v440_v45, %v443_v46  ;;  %v453_v57 = vshrl.u32 %v377_v47, 16 }
  0x61   : > { %v454_v58 = vshrl.u32 %v411_v48, 16  ;;  %v1227_v59 = vcombine.high %v2625_v51, %v2625_v51  ;;  %v1575_v60 = vrot.slane %v1224_v52, %v2660_v29  ;;  %v1250_v61 = vrot.slane %v1234_v49, %v2643_v6 }
  0x62   : > { %2190 = vmatpush3.bf16.msra.mxu0 %v2282_v3  ;;  %v446_v62 = vpack.i.b16 %v412_v43, %v378_v42  ;;  %v449_v63 = vpack.i.b16 %v448_v55, %v447_v54  ;;  %v379_v1 = vcombine.high %v377_v47, %v2415_v0  ;;  %v413_v2 = vcombine.high %v411_v48, %v2415_v0 }
  0x63   : > { %2191 = vmatprep.subr.bf16.mxu0 %v2283_v16  ;;  %v452_v3 = vpack.i.b16 %v411_v48, %v377_v47  ;;  %v455_v4 = vpack.i.b16 %v454_v58, %v453_v57  ;;  %v1241_v5 = vrot.slane %v1227_v59, %v2643_v6  ;;  %v1583_v51 = vrot.slane %v1250_v61, %v2660_v29 }
  0x64   : > { %1629 = vperm.xlu0 %2274, %v1567_v50   ;;  %v1272_v7 = vcombine.high %v1250_v61, %v1250_v61  ;;  %v2134_v9 = vcombine.low %v446_v62, %v449_v63  ;;  %v459_v10 = vshrl.u32 %v379_v1, 16  ;;  %v460_v11 = vshrl.u32 %v413_v2, 16 }
  0x65   : > { %v2135_v12 = vcombine.low %v452_v3, %v455_v4  ;;  %v1257_v14 = vrot.slane %v1241_v5, %v2643_v6  ;;  %v1193_v23 = vcombine.high %v2648_v18, %v2648_v18  ;;  %v1551_v24 = vrot.slane %v2664_v34, %v2660_v29 }
  0x66   : > { %2192 = vmatpush3.bf16.msra.mxu0 %v2283_v16  ;;  %v1591_v13 = vrot.slane %v1272_v7, %v2660_v29  ;;  %v458_v16 = vpack.i.b16 %v413_v2, %v379_v1  ;;  %v461_v17 = vpack.i.b16 %v460_v11, %v459_v10  ;;  %v1242_v31 = vcombine.high %v1234_v49, %v1234_v49 }
  0x67   : > { %v1599_v19 = vrot.slane %v1257_v14, %v2660_v29  ;;  %v1273_v20 = vcombine.high %v1257_v14, %v1257_v14  ;;  %v1215_v25 = vrot.slane %v1193_v23, %v2643_v6  ;;  %1613 = vperm.xlu1 %2275, %v1551_v24   ;;  %vm1002_vm0 = vcmask 130048  }
  0x68   : > { %1637 = vperm.xlu0 %2274, %v1575_v60   ;;  %v2136_v21 = vcombine.low %v458_v16, %v461_v17  ;;  %v1264_v34 = vrot.slane %v1242_v31, %v2643_v6 }
  0x69   : > { %2194 = vmatmul.mubr.bf16.vlgmr.msra.gmra.mxu0 %v2130_v30  ;;  %v1607_v22 = vrot.slane %v1273_v20, %v2660_v29  ;;  %v1555_v26 = vrot.slane %v1215_v25, %v2660_v29  ;;  %v1225_v27 = vcombine.high %v1215_v25, %v1215_v25  ;;  %v1194_v30 = vcombine.high %v2657_v28, %v2657_v28 }
  0x6a   : > { %2197 = vmatprep.mubr.bf16.mxu0 %v2131_v35  ;;  %v1587_v36 = vrot.slane %v1264_v34, %v2660_v29  ;;  %v1274_v39 = vcombine.high %v1264_v34, %v1264_v34  ;;  %v1243_v28 = vcombine.high %v1241_v5, %v1241_v5 }
  0x6b   : > { %1617 = vperm.xlu1 %2275, %v1555_v26   ;;  %v1563_v33 = vrot.slane %v1225_v27, %v2660_v29  ;;  %v1222_v35 = vrot.slane %v1194_v30, %v2643_v6 }
  0x6c   : > { %1645 = vperm.xlu0 %2274, %v1583_v51   ;;  %v1595_v40 = vrot.slane %v1274_v39, %v2660_v29  ;;  %v1271_v8 = vrot.slane %v1243_v28, %v2643_v6 }
  0x6d   : > { %v1571_v18 = vrot.slane %v1222_v35, %v2660_v29  ;;  %v1226_v37 = vcombine.high %v1222_v35, %v1222_v35 }
  0x6e   : > { %v1603_v41 = vrot.slane %v1271_v8, %v2660_v29  ;;  %v1275_v42 = vcombine.high %v1271_v8, %v1271_v8 }
  0x6f   : > { %1625 = vperm.xlu1 %2275, %v1563_v33   ;;  %v1579_v38 = vrot.slane %v1226_v37, %v2660_v29 }
  0x70   : > { %1653 = vperm.xlu0 %2274, %v1591_v13   ;;  %v1611_v43 = vrot.slane %v1275_v42, %v2660_v29 }
  0x71   : > { %2198 = vmatmul.mubr.bf16.gmra.mxu0 %v2132_v53 }
  0x72   : > { %2201 = vmatprep.mubr.bf16.mxu0 %v2133_v56 }
  0x73   : > { %1633 = vperm.xlu1 %2275, %v1571_v18  }
  0x74   : > { %1661 = vperm.xlu0 %2274, %v1599_v19  }
  0x77   : > { %1649 = vperm.xlu1 %2275, %v1587_v36  }
  0x78   : > { %1669 = vperm.xlu0 %2274, %v1607_v22  }
  0x79   : > { %2202 = vmatmul.mubr.bf16.gmra.mxu0 %v2134_v9 }
  0x7a   : > { %2205 = vmatprep.mubr.bf16.mxu0 %v2135_v12 }
  0x7b   : > { %1641 = vperm.xlu1 %2275, %v1579_v38  }
  0x7f   : > { %1657 = vperm.xlu1 %2275, %v1595_v40  }
  0x81   : > { %2206 = vmatmul.mubr.bf16.gmra.mxu0 %v2136_v21 }
  0x83   : > { %1665 = vperm.xlu1 %2275, %v1603_v41  }
  0x87   : > { %1673 = vperm.xlu1 %2275, %v1611_v43  }
  0xcb   : > { %v2732_v8 = vpop.permute.xlu0 %659 }
 0x129   : > { %v2195_v44 = vpop.f32.mrf.mxu0 }
 0x12b   : > { %v592_v45 = vpop.f32.mrf.mxu0 }
 0x12d   : > { %v2196_v46 = vpop.f32.mrf.mxu0 }
 0x12e   : > { %v685_v60 = vcombine.low %v2195_v44, %v2196_v46  ;;  %v686_v29 = vcombine.high %v2195_v44, %v2196_v46 }
 0x12f   : > { %v595_v47 = vpop.f32.mrf.mxu0 }
 0x130   : > { %v683_v57 = vcombine.low %v592_v45, %v595_v47  ;;  %v684_v1 = vcombine.high %v592_v45, %v595_v47  ;;  %v711_v9 = vrot.slane %v685_v60, %v2643_v6  ;;  %v2713_v12 = vrot.slane %v686_v29, %v2643_v6 }
 0x131   : > { %v2199_v48 = vpop.f32.mrf.mxu0 }
 0x132   : > { %v697_v2 = vrot.slane %v683_v57, %v2643_v6  ;;  %v2717_v19 = vrot.slane %v684_v1, %v2643_v6 }
 0x133   : > { %v608_v49 = vpop.f32.mrf.mxu0 }
 0x134   : > { %v747_v20 = vcombine.low %v697_v2, %v711_v9  ;;  %v748_v23 = vcombine.high %v697_v2, %v711_v9  ;;  %v750_v41 = vcombine.high %v2717_v19, %v2713_v12 }
 0x135   : > { %v2200_v50 = vpop.f32.mrf.mxu0 }
 0x136   : > { %v689_v58 = vcombine.low %v2199_v48, %v2200_v50  ;;  %v690_v4 = vcombine.high %v2199_v48, %v2200_v50  ;;  %v775_v43 = vrot.slane %v748_v23, %v2643_v6  ;;  %v761_v44 = vrot.slane %v747_v20, %v2643_v6 }
 0x137   : > { %v611_v52 = vpop.f32.mrf.mxu0  ;;  %v782_v57 = vrot.slane %v750_v41, %v2643_v6 }
 0x138   : > { %v687_v55 = vcombine.low %v608_v49, %v611_v52  ;;  %v739_v3 = vrot.slane %v689_v58, %v2643_v6  ;;  %v688_v5 = vcombine.high %v608_v49, %v611_v52  ;;  %v2720_v24 = vrot.slane %v690_v4, %v2643_v6 }
 0x139   : > { %v2203_v53 = vpop.f32.mrf.mxu0 }
 0x13a   : > { %v725_v61 = vrot.slane %v687_v55, %v2643_v6  ;;  %v732_v25 = vrot.slane %v688_v5, %v2643_v6 }
 0x13b   : > { %v624_v54 = vpop.f32.mrf.mxu0 }
 0x13c   : > { %v752_v10 = vcombine.high %v725_v61, %v739_v3  ;;  %v751_v13 = vcombine.low %v725_v61, %v739_v3  ;;  %v754_v42 = vcombine.high %v732_v25, %v2720_v24  ;;  %v753_v9 = vcombine.low %v732_v25, %v2720_v24  ;;  %v2286_v24 = vld [vmem:[%s2989_s1] sm:$0xff]  }
 0x13d   : > { %v2204_v56 = vpop.f32.mrf.mxu0 }
 0x13e   : > { %v821_v51 = vcombine.low %v2203_v53, %v2204_v56  ;;  %v822_v14 = vcombine.high %v2203_v53, %v2204_v56  ;;  %v803_v35 = vrot.slane %v752_v10, %v2643_v6  ;;  %v789_v37 = vrot.slane %v751_v13, %v2643_v6 }
 0x13f   : > { %v627_v59 = vpop.f32.mrf.mxu0  ;;  %v810_v58 = vrot.slane %v754_v42, %v2643_v6 }
 0x140   : > { %v819_v62 = vcombine.low %v624_v54, %v627_v59  ;;  %v820_v11 = vcombine.high %v624_v54, %v627_v59  ;;  %v847_v26 = vrot.slane %v821_v51, %v2643_v6  ;;  %v854_v18 = vrot.slane %v822_v14, %v2643_v6 }
 0x141   : > { %v2207_v63 = vpop.f32.mrf.mxu0  ;;  %v815_v49 = vcombine.low %v775_v43, %v803_v35  ;;  %v811_v52 = vcombine.low %v761_v44, %v789_v37  ;;  %v816_v29 = vcombine.high %v775_v43, %v803_v35  ;;  %v817_v20 = vcombine.low %v782_v57, %v810_v58 }
 0x142   : > { %v833_v16 = vrot.slane %v819_v62, %v2643_v6  ;;  %v840_v30 = vrot.slane %v820_v11, %v2643_v6  ;;  %v665_v62 = vpop.permute.xlu0 %664  ;;  %v812_v11 = vcombine.high %v761_v44, %v789_v37  ;;  %v818_v37 = vcombine.high %v782_v57, %v810_v58 }
 0x143   : > { %v640_v7 = vpop.f32.mrf.mxu0  ;;  %v972_v1 = vmul.f32 %v815_v49, %v2732_v8  ;;  %v971_v5 = vmul.f32 %v811_v52, %v2732_v8  ;;  %v2772_v52 = vpop.permute.xlu1 %1613 }
 0x144   : > { %v883_v34 = vcombine.low %v833_v16, %v847_v26  ;;  %v884_v36 = vcombine.high %v833_v16, %v847_v26  ;;  %v886_v45 = vcombine.high %v840_v30, %v854_v18  ;;  %v885_v10 = vcombine.low %v840_v30, %v854_v18 }
 0x145   : > { %v2208_v17 = vpop.f32.mrf.mxu0 }
 0x146   : > { %v825_v21 = vcombine.low %v2207_v63, %v2208_v17  ;;  %v826_v22 = vcombine.high %v2207_v63, %v2208_v17  ;;  %v911_v50 = vrot.slane %v884_v36, %v2643_v6  ;;  %v897_v56 = vrot.slane %v883_v34, %v2643_v6 }
 0x147   : > { %v643_v27 = vpop.f32.mrf.mxu0  ;;  %v918_v59 = vrot.slane %v886_v45, %v2643_v6  ;;  %v974_v17 = vmul.f32 %v816_v29, %v2732_v8  ;;  %v904_v30 = vrot.slane %v885_v10, %v2643_v6 }
 0x148   : > { %v823_v31 = vcombine.low %v640_v7, %v643_v27  ;;  %v824_v33 = vcombine.high %v640_v7, %v643_v27  ;;  %v875_v38 = vrot.slane %v825_v21, %v2643_v6  ;;  %v882_v39 = vrot.slane %v826_v22, %v2643_v6 }
 0x149   : > { %v749_v21 = vcombine.low %v2717_v19, %v2713_v12  ;;  %v796_v27 = vrot.slane %v753_v9, %v2643_v6  ;;  %v976_v12 = vmul.f32 %v817_v20, %v2732_v8 }
 0x14a   : > { %v861_v28 = vrot.slane %v823_v31, %v2643_v6  ;;  %v868_v40 = vrot.slane %v824_v33, %v2643_v6  ;;  %v973_v31 = vmul.f32 %v812_v11, %v2732_v8 }
 0x14b   : > { %v768_v19 = vrot.slane %v749_v21, %v2643_v6 }
 0x14c   : > { %v887_v46 = vcombine.low %v861_v28, %v875_v38  ;;  %v888_v47 = vcombine.high %v861_v28, %v875_v38  ;;  %v890_v48 = vcombine.high %v868_v40, %v882_v39  ;;  %v889_v63 = vcombine.low %v868_v40, %v882_v39 }
 0x14d   : > { %v813_v36 = vcombine.low %v768_v19, %v796_v27  ;;  %v978_v40 = vmul.f32 %v818_v37, %v2732_v8  ;;  %v814_v43 = vcombine.high %v768_v19, %v796_v27 }
 0x14e   : > { %v925_v53 = vrot.slane %v887_v46, %v2643_v6  ;;  %v946_v54 = vrot.slane %v890_v48, %v2643_v6  ;;  %v939_v55 = vrot.slane %v888_v47, %v2643_v6  ;;  %v932_v22 = vrot.slane %v889_v63, %v2643_v6 }
 0x14f   : > { %v975_v28 = vmul.f32 %v813_v36, %v2732_v8  ;;  %v977_v45 = vmul.f32 %v814_v43, %v2732_v8 }
 0x150   : > { %v951_v60 = vcombine.low %v911_v50, %v939_v55  ;;  %v947_v61 = vcombine.low %v897_v56, %v925_v53  ;;  %v948_v2 = vcombine.high %v897_v56, %v925_v53  ;;  %v952_v3 = vcombine.high %v911_v50, %v939_v55  ;;  %v2774_v56 = vpop.permute.xlu1 %1617 }
 0x151   : > { %v953_v7 = vcombine.low %v918_v59, %v946_v54  ;;  %v949_v33 = vcombine.low %v904_v30, %v932_v22  ;;  %v954_v34 = vcombine.high %v918_v59, %v946_v54  ;;  %v950_v41 = vcombine.high %v904_v30, %v932_v22 }
 0x152   : > { %v980_v4 = vmul.f32 %v951_v60, %v665_v62  ;;  %v979_v51 = vmul.f32 %v947_v61, %v665_v62  ;;  %v982_v13 = vmul.f32 %v952_v3, %v665_v62  ;;  %v981_v23 = vmul.f32 %v948_v2, %v665_v62 }
 0x153   : > { %v984_v25 = vmul.f32 %v953_v7, %v665_v62  ;;  %v983_v38 = vmul.f32 %v949_v33, %v665_v62  ;;  %v986_v39 = vmul.f32 %v954_v34, %v665_v62  ;;  %v985_v44 = vmul.f32 %v950_v41, %v665_v62 }
 0x154   : > { %v988_v14 = vpack.c.bf16 %v980_v4, %v972_v1  ;;  %v987_v16 = vpack.c.bf16 %v979_v51, %v971_v5  ;;  %v990_v26 = vpack.c.bf16 %v982_v13, %v974_v17  ;;  %v989_v35 = vpack.c.bf16 %v981_v23, %v973_v31  ;;  %v2776_v29 = vpop.permute.xlu1 %1625  ;;  %v2781_v4 = vpop.permute.xlu0 %1621 }
 0x155   : > { %v992_v18 = vpack.c.bf16 %v984_v25, %v976_v12  ;;  %v991_v6 = vpack.c.bf16 %v983_v38, %v975_v28  ;;  %v994_v42 = vpack.c.bf16 %v986_v39, %v978_v40  ;;  %v993_v46 = vpack.c.bf16 %v985_v44, %v977_v45 }
 0x156   : > { %1020 = vmatprep.subr.bf16.mxu1 %v988_v14 }
 0x157   : > { %1021 = vmatpush1.bf16.msra.mxu1 %v987_v16 }
 0x158   : > { %1063 = vmatprep.subr.bf16.mxu1 %v990_v26  ;;  %v1634_v21 = vpop.permute.xlu1 %1633  ;;  %v1630_v33 = vpop.permute.xlu0 %1629 }
 0x15a   : > { %2146 = vmatmul.mubr.msk.bf16.vlgmr.msra.gmra.mxu1 %vm1002_vm0, %v2286_v24 }
 0x15b   : > { %1064 = vmatpush1.bf16.msra.mxu1 %v989_v35  ;;  %1081 = vmatprep.mubr.bf16.mxu1 %v2415_v0 }
 0x15c   : > { %1106 = vmatprep.subr.bf16.mxu1 %v992_v18  ;;  %v2804_v45 = vpop.permute.xlu1 %1649 }
 0x162   : > { %2147 = vmatmul.mubr.msk.bf16.vlgmr.msra.gmra.mxu1 %vm1002_vm0, %v2286_v24 }
 0x163   : > { %1107 = vmatpush1.bf16.msra.mxu1 %v991_v6  ;;  %1124 = vmatprep.mubr.bf16.mxu1 %v2415_v0 }
 0x164   : > { %1149 = vmatprep.subr.bf16.mxu1 %v994_v42 }
 0x16a   : > { %2148 = vmatmul.mubr.msk.bf16.vlgmr.msra.gmra.mxu1 %vm1002_vm0, %v2286_v24 }
 0x16b   : > { %1150 = vmatpush1.bf16.msra.mxu1 %v993_v46  ;;  %1167 = vmatprep.mubr.bf16.mxu1 %v2415_v0 }
 0x172   : > { %2149 = vmatmul.mubr.msk.bf16.vlgmr.msra.gmra.mxu1 %vm1002_vm0, %v2286_v24 }
 0x21a   : > { %v1040_v47 = vpop.f32.mrf.mxu1 }
 0x21c   : > { %v1042_v48 = vpop.f32.mrf.mxu1 }
 0x21e   : > { %v1044_v49 = vpop.f32.mrf.mxu1 }
 0x220   : > { %v1046_v50 = vpop.f32.mrf.mxu1 }
 0x222   : > { %v1083_v53 = vpop.f32.mrf.mxu1 }
 0x223   : > { %v1276_v60 = vcombine.low %v1040_v47, %v1083_v53  ;;  %v1277_v61 = vcombine.high %v1040_v47, %v1083_v53 }
 0x224   : > { %v1085_v54 = vpop.f32.mrf.mxu1 }
 0x225   : > { %v1292_v57 = vcombine.low %v1042_v48, %v1085_v54  ;;  %v1293_v58 = vcombine.high %v1042_v48, %v1085_v54  ;;  %v1284_v3 = vrot.slane %v1276_v60, %v2597_v15  ;;  %v1291_v5 = vrot.slane %v1277_v61, %v2597_v15  ;;  %v1638_v60 = vpop.permute.xlu0 %1637 }
 0x226   : > { %v1087_v55 = vpop.f32.mrf.mxu1 }
 0x227   : > { %v1300_v62 = vrot.slane %v1292_v57, %v2597_v15  ;;  %v1307_v63 = vrot.slane %v1293_v58, %v2597_v15  ;;  %v1412_v51 = vcombine.low %v1044_v49, %v1087_v55  ;;  %v1413_v7 = vcombine.high %v1044_v49, %v1087_v55 }
 0x228   : > { %v1089_v8 = vpop.f32.mrf.mxu1 }
 0x229   : > { %v1428_v1 = vcombine.low %v1046_v50, %v1089_v8  ;;  %v1429_v9 = vcombine.high %v1046_v50, %v1089_v8  ;;  %v1340_v11 = vcombine.low %v1284_v3, %v1300_v62  ;;  %v1341_v13 = vcombine.high %v1284_v3, %v1300_v62 }
 0x22a   : > { %v1126_v59 = vpop.f32.mrf.mxu1  ;;  %v1356_v14 = vcombine.low %v1291_v5, %v1307_v63  ;;  %v1357_v16 = vcombine.high %v1291_v5, %v1307_v63  ;;  %v1420_v26 = vrot.slane %v1412_v51, %v2597_v15  ;;  %v2787_v24 = vrot.slane %v1413_v7, %v2597_v15 }
 0x22b   : > { %v1436_v17 = vrot.slane %v1428_v1, %v2597_v15  ;;  %v2790_v25 = vrot.slane %v1429_v9, %v2597_v15  ;;  %v1348_v30 = vrot.slane %v1340_v11, %v2610_v32  ;;  %v1355_v31 = vrot.slane %v1341_v13, %v2610_v32  ;;  %v2831_v11 = vld [vmem:[%s2992_s4] ss:$0 sm:$0xff]  ;;  %v1642_v13 = vpop.permute.xlu1 %1641 }
 0x22c   : > { %v1128_v0 = vpop.f32.mrf.mxu1  ;;  %v1364_v35 = vrot.slane %v1356_v14, %v2610_v32  ;;  %v1371_v18 = vrot.slane %v1357_v16, %v2610_v32 }
 0x22d   : > { %v1476_v34 = vcombine.low %v1420_v26, %v1436_v17  ;;  %v1477_v36 = vcombine.high %v1420_v26, %v1436_v17  ;;  %v1492_v41 = vcombine.low %v2787_v24, %v2790_v25  ;;  %v1493_v6 = vcombine.high %v2787_v24, %v2790_v25 }
 0x22e   : > { %v1130_v2 = vpop.f32.mrf.mxu1 }
 0x22f   : > { %v2807_v50 = vrot.slane %v1476_v34, %v2610_v32  ;;  %v2810_v53 = vrot.slane %v1477_v36, %v2610_v32 }
 0x230   : > { %v1132_v10 = vpop.f32.mrf.mxu1 }
 0x232   : > { %v1169_v20 = vpop.f32.mrf.mxu1 }
 0x233   : > { %v1308_v22 = vcombine.low %v1126_v59, %v1169_v20  ;;  %v1309_v23 = vcombine.high %v1126_v59, %v1169_v20 }
 0x234   : > { %v1171_v27 = vpop.f32.mrf.mxu1 }
 0x235   : > { %v1324_v12 = vcombine.low %v1128_v0, %v1171_v27  ;;  %v1325_v19 = vcombine.high %v1128_v0, %v1171_v27  ;;  %v1316_v38 = vrot.slane %v1308_v22, %v2597_v15  ;;  %v1323_v39 = vrot.slane %v1309_v23, %v2597_v15 }
 0x236   : > { %v1173_v37 = vpop.f32.mrf.mxu1 }
 0x237   : > { %v1332_v28 = vrot.slane %v1324_v12, %v2597_v15  ;;  %v1339_v40 = vrot.slane %v1325_v19, %v2597_v15  ;;  %v1444_v42 = vcombine.low %v1130_v2, %v1173_v37  ;;  %v1445_v43 = vcombine.high %v1130_v2, %v1173_v37 }
 0x238   : > { %v1175_v44 = vpop.f32.mrf.mxu1 }
 0x239   : > { %v1372_v46 = vcombine.low %v1316_v38, %v1332_v28  ;;  %v1373_v47 = vcombine.high %v1316_v38, %v1332_v28  ;;  %v1388_v48 = vcombine.low %v1323_v39, %v1339_v40  ;;  %v1389_v49 = vcombine.high %v1323_v39, %v1339_v40 }
 0x23a   : > { %v1460_v54 = vcombine.low %v1132_v10, %v1175_v44  ;;  %v1461_v55 = vcombine.high %v1132_v10, %v1175_v44  ;;  %v2817_v61 = vrot.slane %v1444_v42, %v2597_v15  ;;  %v2820_v0 = vrot.slane %v1445_v43, %v2597_v15 }
 0x23b   : > { %v1380_v8 = vrot.slane %v1372_v46, %v2610_v32  ;;  %v1387_v57 = vrot.slane %v1373_v47, %v2610_v32  ;;  %v1396_v58 = vrot.slane %v1388_v48, %v2610_v32  ;;  %v1403_v59 = vrot.slane %v1389_v49, %v2610_v32 }
 0x23c   : > { %v2823_v62 = vrot.slane %v1460_v54, %v2597_v15  ;;  %v2826_v63 = vrot.slane %v1461_v55, %v2597_v15 }
 0x23d   : > { %v1404_v1 = vcombine.low %v1348_v30, %v1380_v8  ;;  %v1405_v2 = vcombine.high %v1348_v30, %v1380_v8  ;;  %v1406_v3 = vcombine.low %v1355_v31, %v1387_v57  ;;  %v1407_v5 = vcombine.high %v1355_v31, %v1387_v57 }
 0x23e   : > { %v1408_v51 = vcombine.low %v1364_v35, %v1396_v58  ;;  %v1409_v7 = vcombine.high %v1364_v35, %v1396_v58  ;;  %v1410_v9 = vcombine.low %v1371_v18, %v1403_v59  ;;  %v1411_v10 = vcombine.high %v1371_v18, %v1403_v59  ;;  %v2841_v35 = vpop.permute.xlu0 %1645  ;;  %v2853_v58 = vpop.permute.xlu1 %1657 }
 0x23f   : > { %v1676_v14 = vmul.f32 %v2772_v52, %v1404_v1  ;;  %v1677_v16 = vmul.f32 %v2774_v56, %v1405_v2  ;;  %v1678_v17 = vmul.f32 %v2781_v4, %v1406_v3  ;;  %v1679_v20 = vmul.f32 %v2776_v29, %v1407_v5 }
 0x240   : > { %v1680_v22 = vmul.f32 %v1630_v33, %v1408_v51  ;;  %v1681_v23 = vmul.f32 %v1634_v21, %v1409_v7  ;;  %v1682_v26 = vmul.f32 %v1638_v60, %v1410_v9  ;;  %v1683_v27 = vmul.f32 %v1642_v13, %v1411_v10 }
 0x241   : > { %v1699_v30 = vadd.f32 %v2831_v11, %v1676_v14  ;;  %v1700_v31 = vadd.f32 %v2831_v11, %v1677_v16  ;;  %v1701_v12 = vadd.f32 %v2831_v11, %v1678_v17  ;;  %v1702_v19 = vadd.f32 %v2831_v11, %v1679_v20 }
 0x242   : > { %v1703_v52 = vadd.f32 %v2831_v11, %v1680_v22  ;;  %v1704_v56 = vadd.f32 %v2831_v11, %v1681_v23  ;;  %v1705_v29 = vadd.f32 %v2831_v11, %v1682_v26  ;;  %v1706_v4 = vadd.f32 %v2831_v11, %v1683_v27  ;;  %v2851_v57 = vpop.permute.xlu0 %1653 }
 0x243   : > { %v1715_v21 = vmax.f32 %v1699_v30, 0.0  ;;  %v1716_v33 = vmax.f32 %v1700_v31, 0.0  ;;  %v1717_v18 = vmax.f32 %v1701_v12, 0.0  ;;  %v1718_v34 = vmax.f32 %v1702_v19, 0.0 }
 0x244   : > { %v1719_v36 = vmax.f32 %v1703_v52, 0.0  ;;  %v1720_v37 = vmax.f32 %v1704_v56, 0.0  ;;  %v1721_v38 = vmax.f32 %v1705_v29, 0.0  ;;  %v1722_v39 = vmax.f32 %v1706_v4, 0.0  ;;  %v1666_v29 = vpop.permute.xlu1 %1665 }
 0x245   : > { %v1731_v28 = vcombine.low %v1715_v21, %v1717_v18  ;;  %v1732_v40 = vcombine.high %v1715_v21, %v1717_v18  ;;  %v1747_v42 = vcombine.low %v1716_v33, %v1718_v34  ;;  %v1748_v43 = vcombine.high %v1716_v33, %v1718_v34 }
 0x246   : > { %v1763_v44 = vcombine.low %v1719_v36, %v1721_v38  ;;  %v1764_v46 = vcombine.high %v1719_v36, %v1721_v38  ;;  %v1779_v47 = vcombine.low %v1720_v37, %v1722_v39  ;;  %v1780_v48 = vcombine.high %v1720_v37, %v1722_v39  ;;  %v1662_v56 = vpop.permute.xlu0 %1661 }
 0x247   : > { %v1739_v49 = vrot.slane %v1731_v28, %v2597_v15  ;;  %v1746_v54 = vrot.slane %v1732_v40, %v2597_v15  ;;  %v1755_v55 = vrot.slane %v1747_v42, %v2597_v15  ;;  %v1762_v8 = vrot.slane %v1748_v43, %v2597_v15 }
 0x248   : > { %v1771_v59 = vrot.slane %v1763_v44, %v2597_v15  ;;  %v1778_v60 = vrot.slane %v1764_v46, %v2597_v15  ;;  %v1787_v1 = vrot.slane %v1779_v47, %v2597_v15  ;;  %v1794_v2 = vrot.slane %v1780_v48, %v2597_v15 }
 0x249   : > { %v1795_v3 = vcombine.low %v1739_v49, %v1755_v55  ;;  %v1796_v5 = vcombine.high %v1739_v49, %v1755_v55  ;;  %v1811_v51 = vcombine.low %v1746_v54, %v1762_v8  ;;  %v1812_v7 = vcombine.high %v1746_v54, %v1762_v8  ;;  %v1674_v54 = vpop.permute.xlu1 %1673 }
 0x24a   : > { %v1827_v9 = vcombine.low %v1771_v59, %v1787_v1  ;;  %v1828_v10 = vcombine.high %v1771_v59, %v1787_v1  ;;  %v1843_v13 = vcombine.low %v1778_v60, %v1794_v2  ;;  %v1844_v14 = vcombine.high %v1778_v60, %v1794_v2  ;;  %v1670_v49 = vpop.permute.xlu0 %1669 }
 0x24b   : > { %v1803_v16 = vrot.slane %v1795_v3, %v2610_v32  ;;  %v1810_v17 = vrot.slane %v1796_v5, %v2610_v32  ;;  %v1819_v20 = vrot.slane %v1811_v51, %v2610_v32  ;;  %v1826_v22 = vrot.slane %v1812_v7, %v2610_v32 }
 0x24c   : > { %v1835_v23 = vrot.slane %v1827_v9, %v2610_v32  ;;  %v1842_v26 = vrot.slane %v1828_v10, %v2610_v32  ;;  %v1851_v27 = vrot.slane %v1843_v13, %v2610_v32  ;;  %v1858_v30 = vrot.slane %v1844_v14, %v2610_v32 }
 0x24d   : > { %v1508_v31 = vcombine.low %v2817_v61, %v2823_v62  ;;  %v1509_v12 = vcombine.high %v2817_v61, %v2823_v62  ;;  %v1524_v19 = vcombine.low %v2820_v0, %v2826_v63  ;;  %v1525_v52 = vcombine.high %v2820_v0, %v2826_v63 }
 0x24e   : > { %v1859_v4 = vcombine.low %v1803_v16, %v1835_v23  ;;  %v1860_v21 = vcombine.high %v1803_v16, %v1835_v23  ;;  %v1861_v33 = vcombine.low %v1810_v17, %v1842_v26  ;;  %v1862_v18 = vcombine.high %v1810_v17, %v1842_v26 }
 0x24f   : > { %v1863_v34 = vcombine.low %v1819_v20, %v1851_v27  ;;  %v1864_v36 = vcombine.high %v1819_v20, %v1851_v27  ;;  %v1865_v37 = vcombine.low %v1826_v22, %v1858_v30  ;;  %v1866_v38 = vcombine.high %v1826_v22, %v1858_v30 }
 0x250   : > { %2003 = vst [vmem:[%s2876_s28] sm:$0xff] %v1859_v4  ;;  %2005 = vst [vmem:[%s2876_s28 + $0x10] sm:$0xff] %v1860_v21  ;;  %v1516_v61 = vrot.slane %v1508_v31, %v2610_v32  ;;  %v1523_v0 = vrot.slane %v1509_v12, %v2610_v32  ;;  %v1532_v62 = vrot.slane %v1524_v19, %v2610_v32 }
 0x251   : > { %2007 = vst [vmem:[%s2876_s28 + $0x20] sm:$0xff] %v1861_v33  ;;  %2009 = vst [vmem:[%s2876_s28 + $0x30] sm:$0xff] %v1862_v18  ;;  %v1539_v63 = vrot.slane %v1525_v52, %v2610_v32  ;;  %v1500_v39 = vrot.slane %v1492_v41, %v2610_v32  ;;  %v1507_v28 = vrot.slane %v1493_v6, %v2610_v32 }
 0x252   : > { %2011 = vst [vmem:[%s2876_s28 + $0x40] sm:$0xff] %v1863_v34  ;;  %2013 = vst [vmem:[%s2876_s28 + $0x50] sm:$0xff] %v1864_v36  ;;  %v1540_v40 = vcombine.low %v2807_v50, %v1516_v61  ;;  %v1541_v42 = vcombine.high %v2807_v50, %v1516_v61  ;;  %v1542_v43 = vcombine.low %v2810_v53, %v1523_v0 }
 0x253   : > { %2015 = vst [vmem:[%s2876_s28 + $0x60] sm:$0xff] %v1865_v37  ;;  %2017 = vst [vmem:[%s2876_s28 + $0x70] sm:$0xff] %v1866_v38  ;;  %v1543_v44 = vcombine.high %v2810_v53, %v1523_v0  ;;  %v1544_v46 = vcombine.low %v1500_v39, %v1532_v62  ;;  %v1545_v47 = vcombine.high %v1500_v39, %v1532_v62 }
 0x254   : > { %v1546_v41 = vcombine.low %v1507_v28, %v1539_v63  ;;  %v1547_v48 = vcombine.high %v1507_v28, %v1539_v63  ;;  %v1684_v24 = vmul.f32 %v2841_v35, %v1540_v40  ;;  %v1685_v25 = vmul.f32 %v2804_v45, %v1541_v42 }
 0x255   : > { %v1686_v6 = vmul.f32 %v2851_v57, %v1542_v43  ;;  %v1687_v55 = vmul.f32 %v2853_v58, %v1543_v44  ;;  %v1688_v8 = vmul.f32 %v1662_v56, %v1544_v46  ;;  %v1689_v50 = vmul.f32 %v1666_v29, %v1545_v47 }
 0x256   : > { %v1690_v59 = vmul.f32 %v1670_v49, %v1546_v41  ;;  %v1691_v60 = vmul.f32 %v1674_v54, %v1547_v48  ;;  %v1707_v53 = vadd.f32 %v2831_v11, %v1684_v24  ;;  %v1708_v1 = vadd.f32 %v2831_v11, %v1685_v25 }
 0x257   : > { %v1709_v2 = vadd.f32 %v2831_v11, %v1686_v6  ;;  %v1710_v3 = vadd.f32 %v2831_v11, %v1687_v55  ;;  %v1711_v35 = vadd.f32 %v2831_v11, %v1688_v8  ;;  %v1712_v45 = vadd.f32 %v2831_v11, %v1689_v50 }
 0x258   : > { %v1713_v57 = vadd.f32 %v2831_v11, %v1690_v59  ;;  %v1714_v58 = vadd.f32 %v2831_v11, %v1691_v60  ;;  %v1723_v5 = vmax.f32 %v1707_v53, 0.0  ;;  %v1724_v51 = vmax.f32 %v1708_v1, 0.0 }
 0x259   : > { %v1725_v7 = vmax.f32 %v1709_v2, 0.0  ;;  %v1726_v9 = vmax.f32 %v1710_v3, 0.0  ;;  %v1727_v10 = vmax.f32 %v1711_v35, 0.0  ;;  %v1728_v13 = vmax.f32 %v1712_v45, 0.0 }
 0x25a   : > { %v1729_v14 = vmax.f32 %v1713_v57, 0.0  ;;  %v1730_v16 = vmax.f32 %v1714_v58, 0.0 }
 0x25b   : > { %v1867_v17 = vcombine.low %v1723_v5, %v1725_v7  ;;  %v1868_v20 = vcombine.high %v1723_v5, %v1725_v7  ;;  %v1883_v22 = vcombine.low %v1724_v51, %v1726_v9  ;;  %v1884_v23 = vcombine.high %v1724_v51, %v1726_v9 }
 0x25c   : > { %v1899_v26 = vcombine.low %v1727_v10, %v1729_v14  ;;  %v1900_v27 = vcombine.high %v1727_v10, %v1729_v14  ;;  %v1915_v30 = vcombine.low %v1728_v13, %v1730_v16  ;;  %v1916_v31 = vcombine.high %v1728_v13, %v1730_v16 }
 0x25d   : > { %v1875_v12 = vrot.slane %v1867_v17, %v2597_v15  ;;  %v1882_v11 = vrot.slane %v1868_v20, %v2597_v15  ;;  %v1891_v19 = vrot.slane %v1883_v22, %v2597_v15  ;;  %v1898_v52 = vrot.slane %v1884_v23, %v2597_v15 }
 0x25e   : > { %v1907_v56 = vrot.slane %v1899_v26, %v2597_v15  ;;  %v1914_v29 = vrot.slane %v1900_v27, %v2597_v15  ;;  %v1923_v4 = vrot.slane %v1915_v30, %v2597_v15  ;;  %v1930_v21 = vrot.slane %v1916_v31, %v2597_v15 }
 0x25f   : > { %v1931_v33 = vcombine.low %v1875_v12, %v1891_v19  ;;  %v1932_v18 = vcombine.high %v1875_v12, %v1891_v19  ;;  %v1947_v34 = vcombine.low %v1882_v11, %v1898_v52  ;;  %v1948_v36 = vcombine.high %v1882_v11, %v1898_v52 }
 0x260   : > { %v1963_v37 = vcombine.low %v1907_v56, %v1923_v4  ;;  %v1964_v38 = vcombine.high %v1907_v56, %v1923_v4  ;;  %v1979_v61 = vcombine.low %v1914_v29, %v1930_v21  ;;  %v1980_v0 = vcombine.high %v1914_v29, %v1930_v21 }
 0x261   : > { %v1939_v62 = vrot.slane %v1931_v33, %v2610_v32  ;;  %v1946_v63 = vrot.slane %v1932_v18, %v2610_v32  ;;  %v1955_v39 = vrot.slane %v1947_v34, %v2610_v32  ;;  %v1962_v28 = vrot.slane %v1948_v36, %v2610_v32 }
 0x262   : > { %v1971_v15 = vrot.slane %v1963_v37, %v2610_v32  ;;  %v1978_v40 = vrot.slane %v1964_v38, %v2610_v32  ;;  %v1987_v42 = vrot.slane %v1979_v61, %v2610_v32  ;;  %v1994_v43 = vrot.slane %v1980_v0, %v2610_v32 }
 0x264   : > { %v1995_v44 = vcombine.low %v1939_v62, %v1971_v15  ;;  %v1996_v46 = vcombine.high %v1939_v62, %v1971_v15  ;;  %v1997_v47 = vcombine.low %v1946_v63, %v1978_v40  ;;  %v1998_v41 = vcombine.high %v1946_v63, %v1978_v40 }
 0x265   : > { %v1999_v48 = vcombine.low %v1955_v39, %v1987_v42  ;;  %v2000_v32 = vcombine.high %v1955_v39, %v1987_v42  ;;  %v2001_v49 = vcombine.low %v1962_v28, %v1994_v43  ;;  %v2002_v54 = vcombine.high %v1962_v28, %v1994_v43 }
 0x266   : > { %2004 = vst [vmem:[%s2876_s28 + $0x8] sm:$0xff] %v1995_v44  ;;  %2006 = vst [vmem:[%s2876_s28 + $0x18] sm:$0xff] %v1996_v46 }
 0x267   : > { %2008 = vst [vmem:[%s2876_s28 + $0x28] sm:$0xff] %v1997_v47  ;;  %2010 = vst [vmem:[%s2876_s28 + $0x38] sm:$0xff] %v1998_v41 }
 0x268   : > { %2012 = vst [vmem:[%s2876_s28 + $0x48] sm:$0xff] %v1999_v48  ;;  %2014 = vst [vmem:[%s2876_s28 + $0x58] sm:$0xff] %v2000_v32 }
 0x269   : > { %2016 = vst [vmem:[%s2876_s28 + $0x68] sm:$0xff] %v2001_v49  ;;  %2018 = vst [vmem:[%s2876_s28 + $0x78] sm:$0xff] %v2002_v54 }
 0x26a   : > { %2354 = shalt.err (!%p2351_p0)
}
 0x26b   : > { %s2355_s6 = scalar_lea.hbm %s2935_s17, 2048  ;;  %s2359_s27 = scalar_lea.hbm %s2993_s5, 4096 }
 0x26c   : > { %p2356_p5 = scmp.ne.s32.totalorder %s2935_s17, %s2355_s6  ;;  %p2360_p4 = scmp.lt.s32.totalorder %s2935_s17, %s2993_s5 }
 0x26d   : > { %p2361_p6 = scmp.lt.s32.totalorder %s2359_s27, %s2355_s6 }
 0x26e   : > { %p2357_p2 = pnand %p2356_p5, %p3011_p11 }
 0x26f   : > { %p2362_p8 = por %p2361_p6, %p2360_p4 }
 0x270   : > { %p2358_p1 = pneg %p2357_p2 }
 0x272   : > { %p2363_p3 = pnand %p2362_p8, %p2358_p1 }
 0x274   : > { %2366 = shalt.err (!%p2363_p3)
}
 0x275   : > { %s2420_s12 = smov 128   ;;  %s2421_s22 = smov 8  }
 0x276   : > { %2215 = dma.vmem_to_hbm [thread:$0]  (%p3011_p11), %s2937_s11, 2048, %s2935_s17, %s2020_s23, %s2420_s12, %s2420_s12, %s2421_s22  }
 0x277 PF: > { %s2049_s9 = sand.u32 1, %s2397_s18   ;;  %p3012_p7 = scmp.ne.s32.totalorder %s3000_s25, 0 }
 0x278   : > { %p3013_p9 = scmp.ge.s32.totalorder %s2409_s21, 2  ;;  %s2050_s24 = scalar_lea.sflag [#allocation4], %s2049_s9 }
 0x27a   : > { %p2226_p10 = pnand %p3013_p9, %p3012_p7 }
 0x27c   : > { %p2227_p12 = pneg %p2226_p10 }
 0x27e   : > { %2392 = dma.done.wait (%p2227_p12), %s2050_s24, 2048  }
 0x27f   : > { %2394 = vsyncadd (%p2227_p12), %s2050_s24, 4294965248  ;;  %p19_p13 = scmp.ge.s32.totalorder %s2506_s30, 4   ;;  %s3014_s18 = smov %s2401_s19 }
 0x280   : > { %s3015_s19 = smov %s2405_s20  ;;  %s3016_s20 = smov %s2526_s13 }
 0x281   : > { %s3017_s21 = smov %s2506_s30  ;;  %21 = sbr.rel (!%p19_p13) target bundleno = 6 (0x6), region = 89 }
 0x286   :  { %2055 = vsyncpa [#allocation3], 1 }
 0x287   :  { %2057 = vsyncpa [#allocation3 + $0x1], 1 }
 0x288   :  { %2058 = vsyncpa [#allocation6], 1 }
 0x289   :  { %2059 = vsyncpa [#allocation4], 1 }
 0x28a   :  { %2061 = vsyncpa [#allocation4 + $0x1], 1 }

</bundles_post_ra>
